<compile_context>
chip_gen: v6e
topology: v6e:2x2x1
jax: 0.10.0
libtpu: 0.0.40
codegen_flags: <defaults>
</compile_context>

<pallas_src>
import functools

import jax
import jax.numpy as jnp
from jax.experimental import pallas as pl
from jax.experimental.pallas import tpu as pltpu


def _ffn_kernel(x_ref, g_ref, beta_ref, w1_ref, b1_ref, w2_ref, b2_ref,
                o_ref, xn_ref, *, d_true):
    """One (row-tile, hidden-tile) step of the FeedForward forward pass.

    x_ref    : (TM, Dp)  input rows (f32; Dp = dim padded to a multiple of 128)
    g_ref    : (1, Dp)   LayerNorm weight (gamma), zero in padded columns
    beta_ref : (1, Dp)   LayerNorm bias (beta), zero in padded columns
    w1_ref   : (Dp, TH)  first Linear weight tile (bf16, (in, out) layout)
    b1_ref   : (1, TH)   first Linear bias tile
    w2_ref   : (TH, Dp)  second Linear weight tile (bf16, (in, out) layout)
    b2_ref   : (1, Dp)   second Linear bias (zero in padded columns)
    o_ref    : (TM, Dp)  f32 output rows -- doubles as the cross-th accumulator
    xn_ref   : (TM, Dp)  VMEM scratch: cached LayerNorm output (bf16 MXU operand)
    """
    th = pl.program_id(1)
    d_pad = x_ref.shape[-1]

    # --- LayerNorm over the true last axis (eps = 1e-5, nn.LayerNorm default) ---
    # Computed once per row tile; reused across all hidden tiles.
    @pl.when(th == 0)
    def _():
        x = x_ref[...].astype(jnp.float32)
        inv_d = jnp.float32(1.0 / d_true)
        mean = jnp.sum(x, axis=-1, keepdims=True) * inv_d
        centered = x - mean
        if d_pad != d_true:
            # Padded columns of x are zero; mask them so they don't bias the variance.
            col = jax.lax.broadcasted_iota(jnp.int32, (1, d_pad), 1)
            centered = jnp.where(col < d_true, centered, jnp.float32(0.0))
        var = jnp.sum(centered * centered, axis=-1, keepdims=True) * inv_d
        xn = centered * jax.lax.rsqrt(var + jnp.float32(1e-5))
        xn = xn * g_ref[...].astype(jnp.float32) + beta_ref[...].astype(jnp.float32)
        xn_ref[...] = xn.astype(xn_ref.dtype)

    # --- Linear(dim -> hidden_tile) on the MXU (bf16 operands, f32 accumulate) ---
    h = jnp.dot(xn_ref[...], w1_ref[...], preferred_element_type=jnp.float32)
    h = h + b1_ref[...].astype(jnp.float32)

    # --- GELU (exact / erf form, matching nn.GELU() default), f32 on the VPU ---
    h = 0.5 * h * (1.0 + jax.lax.erf(h * jnp.float32(0.7071067811865476)))

    # Dropout(p=0.0) is identity — skipped.

    # --- Linear(hidden_tile -> dim) partial sum, accumulated straight into the f32 output ---
    partial = jnp.dot(h.astype(w2_ref.dtype), w2_ref[...],
                      preferred_element_type=jnp.float32)

    @pl.when(th == 0)
    def _():
        o_ref[...] = partial + b2_ref[...].astype(jnp.float32)

    @pl.when(th > 0)
    def _():
        o_ref[...] += partial


def _round_up(a, b):
    return ((a + b - 1) // b) * b


def _defaults_for_chip():
    """(tile_rows, vmem_limit_mb) per generation. Guarded: falls back to safe values."""
    try:
        kind = jax.devices()[0].device_kind.lower()
    except Exception:
        kind = ""
    if "v6" in kind:
        return 512, 96    # 128 MiB VMEM; bigger row tile halves weight re-streaming
    if "v5" in kind:
        return 256, 96    # ~balanced at TM=256; keep VMEM for double-buffering
    return 256, 48        # v7x / unknown: 64 MiB physical VMEM -> leave compiler headroom


def _pick_row_tile(rows, tile_rows):
    rows8 = _round_up(rows, 8)
    if rows8 <= tile_rows:
        return rows8
    # Prefer a tile that divides rows exactly (avoids a padded HBM copy of x).
    for tm in range(tile_rows, tile_rows // 2 - 1, -8):
        if rows % tm == 0:
            return tm
    return tile_rows


def _pick_hidden_tile(hp, max_th):
    """hp is already a multiple of 128."""
    if hp <= max_th:
        return hp
    for cand in range(max_th, 127, -128):
        if hp % cand == 0:
            return cand
    return 128


def feed_forward(x, params, *, tile_rows=None, max_hidden_tile=256, vmem_limit_mb=None):
    """x: (B, S, D) float32. params: prepared dict from init_params (bf16 weights, 128-padded)."""
    B, S, D = x.shape
    Dp, Hp = params["w1"].shape
    assert Dp % 128 == 0 and Hp % 128 == 0 and Dp >= D, "params must come from init_params"
    rows = B * S

    chip_tm, chip_vmem = _defaults_for_chip()
    if tile_rows is None:
        tile_rows = chip_tm
    if vmem_limit_mb is None:
        vmem_limit_mb = chip_vmem

    TM = _pick_row_tile(rows, tile_rows)
    TH = _pick_hidden_tile(Hp, max_hidden_tile)
    rows_p = _round_up(rows, TM)

    x2d = x.astype(jnp.float32).reshape(rows, D)
    pad_r, pad_d = rows_p - rows, Dp - D
    if pad_r or pad_d:
        x2d = jnp.pad(x2d, ((0, pad_r), (0, pad_d)))

    grid = (rows_p // TM, Hp // TH)
    kernel = functools.partial(_ffn_kernel, d_true=D)

    out2d = pl.pallas_call(
        kernel,
        out_shape=jax.ShapeDtypeStruct((rows_p, Dp), jnp.float32),
        grid_spec=pltpu.PrefetchScalarGridSpec(
            num_scalar_prefetch=0,
            grid=grid,
            in_specs=[
                pl.BlockSpec((TM, Dp), lambda i, t: (i, 0)),    # x rows (re-DMA only when i changes)
                pl.BlockSpec((1, Dp), lambda i, t: (0, 0)),     # ln gamma
                pl.BlockSpec((1, Dp), lambda i, t: (0, 0)),     # ln beta
                pl.BlockSpec((Dp, TH), lambda i, t: (0, t)),    # w1 hidden tile (streamed, bf16)
                pl.BlockSpec((1, TH), lambda i, t: (0, t)),     # b1 hidden tile
                pl.BlockSpec((TH, Dp), lambda i, t: (t, 0)),    # w2 hidden tile (streamed, bf16)
                pl.BlockSpec((1, Dp), lambda i, t: (0, 0)),     # b2
            ],
            out_specs=pl.BlockSpec((TM, Dp), lambda i, t: (i, 0)),   # resident across t: accumulator
            scratch_shapes=[
                pltpu.VMEM((TM, Dp), jnp.bfloat16),   # cached LayerNorm output (MXU operand)
            ],
        ),
        compiler_params=pltpu.CompilerParams(
            # Row axis shards across TensorCores; hidden axis is the reduction.
            dimension_semantics=("parallel", "arbitrary"),
            vmem_limit_bytes=int(vmem_limit_mb) * 1024 * 1024,
        ),
    )(x2d, params["gamma"], params["beta"], params["w1"], params["b1"],
      params["w2"], params["b2"])

    out2d = out2d[:rows, :D]
    return out2d.reshape(B, S, D).astype(x.dtype)


def init_params(key, dim, hidden_dim):
    """Deterministic synthetic init mirroring the module's parameter shapes.

    Weights are padded to lane-dense (multiple-of-128) shapes and cast to bf16 ONCE here,
    so feed_forward never pays a per-call cast/pad of the weight matrices.
    """
    dp = _round_up(dim, 128)
    hp = _round_up(hidden_dim, 128)
    k1, k2, k3, k4 = jax.random.split(key, 4)

    # nn.LayerNorm defaults: weight=1, bias=0 (zero in padded columns -> padded xn is 0).
    gamma = jnp.zeros((1, dp), jnp.float32).at[:, :dim].set(1.0)
    beta = jnp.zeros((1, dp), jnp.float32)

    # nn.Linear weights are (out, in) in torch; stored here as (in, out) for x @ W.
    w1 = jnp.zeros((dp, hp), jnp.float32).at[:dim, :hidden_dim].set(
        jax.random.normal(k1, (dim, hidden_dim), jnp.float32) * 0.02)
    b1 = jnp.zeros((1, hp), jnp.float32).at[:, :hidden_dim].set(
        jax.random.normal(k2, (1, hidden_dim), jnp.float32) * 0.02)
    w2 = jnp.zeros((hp, dp), jnp.float32).at[:hidden_dim, :dim].set(
        jax.random.normal(k3, (hidden_dim, dim), jnp.float32) * 0.02)
    b2 = jnp.zeros((1, dp), jnp.float32).at[:, :dim].set(
        jax.random.normal(k4, (1, dim), jnp.float32) * 0.02)

    return dict(gamma=gamma, beta=beta,
                w1=w1.astype(jnp.bfloat16), b1=b1,
                w2=w2.astype(jnp.bfloat16), b2=b2)


def _reference(x, p, dim, hidden_dim):
    """Pure-JAX f32 reference of the same forward (using the same bf16 weight values)."""
    g = p["gamma"][0, :dim]
    bta = p["beta"][0, :dim]
    w1 = p["w1"][:dim, :hidden_dim].astype(jnp.float32)
    b1 = p["b1"][0, :hidden_dim]
    w2 = p["w2"][:hidden_dim, :dim].astype(jnp.float32)
    b2 = p["b2"][0, :dim]

    mean = jnp.mean(x, axis=-1, keepdims=True)
    var = jnp.mean((x - mean) ** 2, axis=-1, keepdims=True)
    xn = (x - mean) * jax.lax.rsqrt(var + 1e-5) * g + bta
    h = xn @ w1 + b1
    h = 0.5 * h * (1.0 + jax.lax.erf(h / jnp.sqrt(2.0)))
    return h @ w2 + b2


if __name__ == "__main__":
    B, S, D, H = 2, 8, 32, 64
    key = jax.random.PRNGKey(0)
    kx, kp = jax.random.split(key)

    x = jax.random.normal(kx, (B, S, D), jnp.float32)
    params = init_params(kp, D, H)

    out = feed_forward(x, params)
    out = jax.block_until_ready(out)

    ref = _reference(x, params, D, H)
    assert out.shape == (B, S, D)
    # bf16 MXU operands introduce small, expected deviation vs the f32 reference.
    max_err = float(jnp.max(jnp.abs(out - ref)))
    assert jnp.allclose(out, ref, atol=1e-2, rtol=1e-2), \
        f"mismatch vs reference (max abs err {max_err})"

    print("KERNEL_OK")
</pallas_src>

<mosaic_0001>
module attributes {stable_mosaic.version = 11 : i64} {
  func.func @_ffn_kernel(%arg0: i32, %arg1: i32, %arg2: memref<16x128xf32, #tpu.memory_space<vmem>>, %arg3: memref<1x128xf32, #tpu.memory_space<vmem>>, %arg4: memref<1x128xf32, #tpu.memory_space<vmem>>, %arg5: memref<128x128xbf16, #tpu.memory_space<vmem>>, %arg6: memref<1x128xf32, #tpu.memory_space<vmem>>, %arg7: memref<128x128xbf16, #tpu.memory_space<vmem>>, %arg8: memref<1x128xf32, #tpu.memory_space<vmem>>, %arg9: memref<16x128xf32, #tpu.memory_space<vmem>>, %arg10: memref<16x128xbf16, #tpu.memory_space<vmem>>) attributes {dimension_semantics = [#tpu.dimension_semantics<parallel>, #tpu.dimension_semantics<arbitrary>], iteration_bounds = array<i64: 1, 1>, scalar_prefetch = 0 : i64, scratch_operands = 1 : i64, tpu.core_type = #tpu.core_type<tc>, window_params = [{transform_indices = @transform_0, window_bounds = array<i64: 16, 128>}, {pipeline_mode = #tpu.pipeline_mode<synchronous>, transform_indices = @transform_1, window_bounds = array<i64: 1, 128>}, {pipeline_mode = #tpu.pipeline_mode<synchronous>, transform_indices = @transform_2, window_bounds = array<i64: 1, 128>}, {transform_indices = @transform_3, window_bounds = array<i64: 128, 128>}, {transform_indices = @transform_4, window_bounds = array<i64: 1, 128>}, {transform_indices = @transform_5, window_bounds = array<i64: 128, 128>}, {pipeline_mode = #tpu.pipeline_mode<synchronous>, transform_indices = @transform_6, window_bounds = array<i64: 1, 128>}, {transform_indices = @transform_7, window_bounds = array<i64: 16, 128>}]} {
    %c0_i32 = arith.constant 0 : i32
    %0 = arith.cmpi eq, %arg1, %c0_i32 : i32
    %1 = arith.extui %0 : i1 to i32
    %c0_i32_0 = arith.constant 0 : i32
    %2 = arith.cmpi ne, %1, %c0_i32_0 : i32
    scf.if %2 {
      %c0_16 = arith.constant 0 : index
      %c0_17 = arith.constant 0 : index
      %26 = vector.load %arg2[%c0_16, %c0_17] : memref<16x128xf32, #tpu.memory_space<vmem>>, vector<16x128xf32>
      %cst_18 = arith.constant dense<0.000000e+00> : vector<16xf32>
      %27 = vector.multi_reduction <add>, %26, %cst_18 [1] : vector<16x128xf32> to vector<16xf32>
      %28 = vector.shape_cast %27 : vector<16xf32> to vector<16x1xf32>
      %cst_19 = arith.constant 3.125000e-02 : f32
      %29 = vector.broadcast %cst_19 : f32 to vector<16x1xf32>
      %30 = arith.mulf %28, %29 : vector<16x1xf32>
      %31 = vector.broadcast %30 : vector<16x1xf32> to vector<16x128xf32>
      %32 = arith.subf %26, %31 : vector<16x128xf32>
      %33 = tpu.iota {dimensions = array<i32: 1>} : vector<1x128xi32>
      %c32_i32 = arith.constant 32 : i32
      %34 = vector.broadcast %c32_i32 : i32 to vector<1x128xi32>
      %35 = arith.cmpi slt, %33, %34 : vector<1x128xi32>
      %cst_20 = arith.constant 0.000000e+00 : f32
      %36 = vector.shape_cast %35 : vector<1x128xi1> to vector<1x128xi1>
      %37 = vector.broadcast %36 : vector<1x128xi1> to vector<16x128xi1>
      %38 = vector.broadcast %cst_20 : f32 to vector<16x128xf32>
      %39 = arith.select %37, %32, %38 : vector<16x128xi1>, vector<16x128xf32>
      %40 = arith.mulf %39, %39 : vector<16x128xf32>
      %cst_21 = arith.constant dense<0.000000e+00> : vector<16xf32>
      %41 = vector.multi_reduction <add>, %40, %cst_21 [1] : vector<16x128xf32> to vector<16xf32>
      %42 = vector.shape_cast %41 : vector<16xf32> to vector<16x1xf32>
      %cst_22 = arith.constant 3.125000e-02 : f32
      %43 = vector.broadcast %cst_22 : f32 to vector<16x1xf32>
      %44 = arith.mulf %42, %43 : vector<16x1xf32>
      %cst_23 = arith.constant 9.99999974E-6 : f32
      %45 = vector.broadcast %cst_23 : f32 to vector<16x1xf32>
      %46 = arith.addf %44, %45 : vector<16x1xf32>
      %47 = math.rsqrt %46 : vector<16x1xf32>
      %48 = vector.broadcast %47 : vector<16x1xf32> to vector<16x128xf32>
      %49 = arith.mulf %39, %48 : vector<16x128xf32>
      %c0_24 = arith.constant 0 : index
      %c0_25 = arith.constant 0 : index
      %50 = vector.load %arg3[%c0_24, %c0_25] : memref<1x128xf32, #tpu.memory_space<vmem>>, vector<1x128xf32>
      %51 = vector.broadcast %50 : vector<1x128xf32> to vector<16x128xf32>
      %52 = arith.mulf %49, %51 : vector<16x128xf32>
      %c0_26 = arith.constant 0 : index
      %c0_27 = arith.constant 0 : index
      %53 = vector.load %arg4[%c0_26, %c0_27] : memref<1x128xf32, #tpu.memory_space<vmem>>, vector<1x128xf32>
      %54 = vector.broadcast %53 : vector<1x128xf32> to vector<16x128xf32>
      %55 = arith.addf %52, %54 : vector<16x128xf32>
      %56 = arith.truncf %55 : vector<16x128xf32> to vector<16x128xbf16>
      %c0_28 = arith.constant 0 : index
      %c0_29 = arith.constant 0 : index
      %57 = vector.load %arg10[%c0_28, %c0_29] : memref<16x128xbf16, #tpu.memory_space<vmem>>, vector<16x128xbf16>
      tpu.vector_store %arg10[%c0_28, %c0_29], %56 {strides = array<i32>} : memref<16x128xbf16, #tpu.memory_space<vmem>>, vector<16x128xbf16>,
    } else {
    }
    %c0 = arith.constant 0 : index
    %c0_1 = arith.constant 0 : index
    %3 = vector.load %arg10[%c0, %c0_1] : memref<16x128xbf16, #tpu.memory_space<vmem>>, vector<16x128xbf16>
    %c0_2 = arith.constant 0 : index
    %c0_3 = arith.constant 0 : index
    %4 = vector.load %arg5[%c0_2, %c0_3] : memref<128x128xbf16, #tpu.memory_space<vmem>>, vector<128x128xbf16>
    %cst = arith.constant dense<0.000000e+00> : vector<16x128xf32>
    %5 = tpu.matmul %3, %4, %cst {dimension_numbers = #tpu.dot_dimension_numbers<[1], [0], [0], [1], [0, 0, 1, 1], [], []>} : vector<16x128xbf16>, vector<128x128xbf16>, vector<16x128xf32> -> vector<16x128xf32>
    %c0_4 = arith.constant 0 : index
    %c0_5 = arith.constant 0 : index
    %6 = vector.load %arg6[%c0_4, %c0_5] : memref<1x128xf32, #tpu.memory_space<vmem>>, vector<1x128xf32>
    %7 = vector.broadcast %6 : vector<1x128xf32> to vector<16x128xf32>
    %8 = arith.addf %5, %7 : vector<16x128xf32>
    %cst_6 = arith.constant 5.000000e-01 : f32
    %9 = vector.broadcast %cst_6 : f32 to vector<16x128xf32>
    %10 = arith.mulf %9, %8 : vector<16x128xf32>
    %cst_7 = arith.constant 0.707106769 : f32
    %11 = vector.broadcast %cst_7 : f32 to vector<16x128xf32>
    %12 = arith.mulf %8, %11 : vector<16x128xf32>
    %13 = math.erf %12 : vector<16x128xf32>
    %cst_8 = arith.constant 1.000000e+00 : f32
    %14 = vector.broadcast %cst_8 : f32 to vector<16x128xf32>
    %15 = arith.addf %14, %13 : vector<16x128xf32>
    %16 = arith.mulf %10, %15 : vector<16x128xf32>
    %17 = arith.truncf %16 : vector<16x128xf32> to vector<16x128xbf16>
    %c0_9 = arith.constant 0 : index
    %c0_10 = arith.constant 0 : index
    %18 = vector.load %arg7[%c0_9, %c0_10] : memref<128x128xbf16, #tpu.memory_space<vmem>>, vector<128x128xbf16>
    %cst_11 = arith.constant dense<0.000000e+00> : vector<16x128xf32>
    %19 = tpu.matmul %17, %18, %cst_11 {dimension_numbers = #tpu.dot_dimension_numbers<[1], [0], [0], [1], [0, 0, 1, 1], [], []>} : vector<16x128xbf16>, vector<128x128xbf16>, vector<16x128xf32> -> vector<16x128xf32>
    %c0_i32_12 = arith.constant 0 : i32
    %20 = arith.cmpi eq, %arg1, %c0_i32_12 : i32
    %21 = arith.extui %20 : i1 to i32
    %c0_i32_13 = arith.constant 0 : i32
    %22 = arith.cmpi ne, %21, %c0_i32_13 : i32
    scf.if %22 {
      %c0_16 = arith.constant 0 : index
      %c0_17 = arith.constant 0 : index
      %26 = vector.load %arg8[%c0_16, %c0_17] : memref<1x128xf32, #tpu.memory_space<vmem>>, vector<1x128xf32>
      %27 = vector.broadcast %26 : vector<1x128xf32> to vector<16x128xf32>
      %28 = arith.addf %19, %27 : vector<16x128xf32>
      %c0_18 = arith.constant 0 : index
      %c0_19 = arith.constant 0 : index
      %29 = vector.load %arg9[%c0_18, %c0_19] : memref<16x128xf32, #tpu.memory_space<vmem>>, vector<16x128xf32>
      tpu.vector_store %arg9[%c0_18, %c0_19], %28 {strides = array<i32>} : memref<16x128xf32, #tpu.memory_space<vmem>>, vector<16x128xf32>,
    } else {
    }
    %c0_i32_14 = arith.constant 0 : i32
    %23 = arith.cmpi sgt, %arg1, %c0_i32_14 : i32
    %24 = arith.extui %23 : i1 to i32
    %c0_i32_15 = arith.constant 0 : i32
    %25 = arith.cmpi ne, %24, %c0_i32_15 : i32
    scf.if %25 {
      %c0_16 = arith.constant 0 : index
      %c0_17 = arith.constant 0 : index
      %26 = vector.load %arg9[%c0_16, %c0_17] : memref<16x128xf32, #tpu.memory_space<vmem>>, vector<16x128xf32>
      %27 = arith.addf %26, %19 : vector<16x128xf32>
      %c0_18 = arith.constant 0 : index
      %c0_19 = arith.constant 0 : index
      %28 = vector.load %arg9[%c0_18, %c0_19] : memref<16x128xf32, #tpu.memory_space<vmem>>, vector<16x128xf32>
      tpu.vector_store %arg9[%c0_18, %c0_19], %27 {strides = array<i32>} : memref<16x128xf32, #tpu.memory_space<vmem>>, vector<16x128xf32>,
    } else {
    }
    return
  }
  func.func @transform_0(%arg0: i32, %arg1: i32) -> (i32, i32) {
    %c0_i32 = arith.constant 0 : i32
    %c0_i32_0 = arith.constant 0 : i32
    return %arg0, %c0_i32 : i32, i32
  }
  func.func @transform_1(%arg0: i32, %arg1: i32) -> (i32, i32) {
    %c0_i32 = arith.constant 0 : i32
    %c0_i32_0 = arith.constant 0 : i32
    %c0_i32_1 = arith.constant 0 : i32
    return %c0_i32, %c0_i32_0 : i32, i32
  }
  func.func @transform_2(%arg0: i32, %arg1: i32) -> (i32, i32) {
    %c0_i32 = arith.constant 0 : i32
    %c0_i32_0 = arith.constant 0 : i32
    %c0_i32_1 = arith.constant 0 : i32
    return %c0_i32, %c0_i32_0 : i32, i32
  }
  func.func @transform_3(%arg0: i32, %arg1: i32) -> (i32, i32) {
    %c0_i32 = arith.constant 0 : i32
    %c0_i32_0 = arith.constant 0 : i32
    return %c0_i32, %arg1 : i32, i32
  }
  func.func @transform_4(%arg0: i32, %arg1: i32) -> (i32, i32) {
    %c0_i32 = arith.constant 0 : i32
    %c0_i32_0 = arith.constant 0 : i32
    return %c0_i32, %arg1 : i32, i32
  }
  func.func @transform_5(%arg0: i32, %arg1: i32) -> (i32, i32) {
    %c0_i32 = arith.constant 0 : i32
    %c0_i32_0 = arith.constant 0 : i32
    return %arg1, %c0_i32 : i32, i32
  }
  func.func @transform_6(%arg0: i32, %arg1: i32) -> (i32, i32) {
    %c0_i32 = arith.constant 0 : i32
    %c0_i32_0 = arith.constant 0 : i32
    %c0_i32_1 = arith.constant 0 : i32
    return %c0_i32, %c0_i32_0 : i32, i32
  }
  func.func @transform_7(%arg0: i32, %arg1: i32) -> (i32, i32) {
    %c0_i32 = arith.constant 0 : i32
    %c0_i32_0 = arith.constant 0 : i32
    return %arg0, %c0_i32 : i32, i32
  }
}

</mosaic_0001>

<bundles_post_ra>
// kernel: tpu_custom_call.1
= control target key start
LH: loop header
LB: loop body
LE: loop exit
PB: predicated region body
PF: predicated region fallthrough
CT: control target
= control target key end

     0   :  { %12 = vsyncpa [#allocation4], 0  ;;  %s717_s0 = inlined_call_operand.hbm [shape: f32[16,128], index: 0, kind: input, shape index: {}]   ;;  %s718_s1 = inlined_call_operand.vmem [shape: f32[1,128], index: 1, kind: input, shape index: {}]   ;;  %s719_s2 = inlined_call_operand.vmem [shape: f32[1,128], index: 2, kind: input, shape index: {}]   ;;  %s720_s3 = inlined_call_operand.hbm [shape: bf16[128,128], index: 3, kind: input, shape index: {}]   ;;  %s721_s4 = inlined_call_operand.vmem [shape: f32[1,128], index: 4, kind: input, shape index: {}]   ;;  %s722_s5 = inlined_call_operand.hbm [shape: bf16[128,128], index: 5, kind: input, shape index: {}]   ;;  %s723_s6 = inlined_call_operand.vmem [shape: f32[1,128], index: 6, kind: input, shape index: {}]   ;;  %s724_s7 = inlined_call_operand.hbm [shape: f32[16,128], index: 7, kind: output, shape index: {}]  }
   0x1   :  { %13 = vsyncpa [#allocation7], 0 }
   0x2   :  { %14 = vsyncpa [#allocation5], 0  ;;  %s619_s24 = smov [#allocation6]  }
   0x3   :  { %s36_s25 = sshll.u32 %s619_s24, 4  ;;  %s37_s25 = int_to_ptr.vmem [resolvable:$true] %s36_s25 }
   0x4   :  { %s541_s26 = scalar_lea.vmem %s37_s25, 1024  ;;  %p546_p1 = scmp.lt.s32.totalorder %s37_s25, %s37_s25 }
   0x5   :  { %p542_p0 = scmp.ne.s32.totalorder %s37_s25, %s541_s26  ;;  %p547_p2 = scmp.lt.s32.totalorder %s541_s26, %s541_s26 }
   0x7   :  { %p548_p3 = por %p547_p2, %p546_p1 }
   0x9   :  { %p549_p4 = pnand %p548_p3, %p542_p0 }
   0xb   :  { %552 = shalt.err (!%p549_p4)
}
   0xc   :  { %s620_s27 = smov 64   ;;  %s621_s28 = smov 4  }
   0xd   :  { %42 = dma.hbm_to_vmem [thread:$0]  %s720_s3, 1024, %s37_s25, [#allocation7], %s620_s27, %s620_s27, %s621_s28  }
   0xe   :  { %s622_s8 = smov [#allocation3]  }
   0xf   :  { %s20_s9 = sshll.u32 %s622_s8, 4  ;;  %s21_s9 = int_to_ptr.vmem [resolvable:$true] %s20_s9 }
  0x10   :  { %s561_s10 = scalar_lea.vmem %s21_s9, 256  ;;  %p566_p6 = scmp.lt.s32.totalorder %s21_s9, %s21_s9 }
  0x11   :  { %p562_p5 = scmp.ne.s32.totalorder %s21_s9, %s561_s10  ;;  %p567_p7 = scmp.lt.s32.totalorder %s561_s10, %s561_s10 }
  0x13   :  { %p568_p8 = por %p567_p7, %p566_p6 }
  0x15   :  { %p569_p9 = pnand %p568_p8, %p562_p5 }
  0x17   :  { %572 = shalt.err (!%p569_p9)
}
  0x18   :  { %s623_s11 = smov 128   ;;  %s624_s12 = smov 8  }
  0x19   :  { %26 = dma.hbm_to_vmem [thread:$0]  %s717_s0, 256, %s21_s9, [#allocation4], %s623_s11, %s623_s11, %s624_s12  }
  0x1a   :  { %s625_s3 = smov [#allocation8]  }
  0x1b   :  { %s50_s15 = sshll.u32 %s625_s3, 4  ;;  %s51_s15 = int_to_ptr.vmem [resolvable:$true] %s50_s15 }
  0x1c   :  { %s581_s16 = scalar_lea.vmem %s51_s15, 1024  ;;  %p586_p11 = scmp.lt.s32.totalorder %s51_s15, %s51_s15 }
  0x1d   :  { %p582_p10 = scmp.ne.s32.totalorder %s51_s15, %s581_s16  ;;  %p587_p12 = scmp.lt.s32.totalorder %s581_s16, %s581_s16 }
  0x1f   :  { %p588_p13 = por %p587_p12, %p586_p11 }
  0x21   :  { %p589_p0 = pnand %p588_p13, %p582_p10 }
  0x23   :  { %592 = shalt.err (!%p589_p0)
}
  0x24   :  { %56 = dma.hbm_to_vmem [thread:$0]  %s722_s5, 1024, %s51_s15, [#allocation7], %s620_s27, %s620_s27, %s621_s28  }
  0x25   :  { %613 = dma.done.wait [#allocation4], 256  }
  0x26   :  { %614 = vsyncadd [#allocation4], 4294967040 }
  0x27   :  { %615 = dma.done.wait [#allocation7], 2048  }
  0x28   :  { %616 = vsyncadd [#allocation7], 4294965248  ;;  %v73_v0 = vld [vmem:[#allocation3] sm:$0xff]  ;;  %v74_v1 = vld [vmem:[#allocation3 + $0x8] sm:$0xff]  ;;  %v83_v2 = vlaneseq  ;;  %v626_v15 = vmov 0.0   ;;  %vm627_vm1 = vmmov 0  }
  0x29   :  { %75 = vadd.xlane.f32.xlu0 %v73_v0  ;;  %v508_v14 = vld [vmem:[#allocation6 + $0x38] sm:$0xff]   ;;  %458 = vmatprep.subr.bf16.mxu0 %v626_v15  ;;  %v509_v16 = vld [vmem:[#allocation6 + $0x30] sm:$0xff]   ;;  %v510_v17 = vld [vmem:[#allocation6 + $0x28] sm:$0xff]   ;;  %s628_s22 = smov [#allocation9]  }
  0x2a   :  { %v84_v3 = vand.u32 127, %v83_v2  ;;  %478 = vmatprep.subr.bf16.mxu1 %v626_v15  ;;  %459 = vmatpush3.bf16.msra.mxu0 %v508_v14  ;;  %v511_v18 = vld [vmem:[#allocation6 + $0x20] sm:$0xff]   ;;  %v512_v19 = vld [vmem:[#allocation6 + $0x18] sm:$0xff]   ;;  %v513_v20 = vld [vmem:[#allocation6 + $0x10] sm:$0xff]   ;;  %s397_s23 = sshll.u32 %s628_s22, 4  ;;  %s398_s23 = int_to_ptr.vmem [resolvable:$true] %s397_s23 }
  0x2b   :  { %460 = vmatprep.subr.bf16.mxu0 %v626_v15  ;;  %v514_v21 = vld [vmem:[#allocation6 + $0x8] sm:$0xff]   ;;  %474 = vmatprep.mubr.msk.bf16.mxu0 %vm627_vm1, %v626_v15  ;;  %v515_v22 = vld [vmem:[#allocation6] sm:$0xff]   ;;  %v517_v23 = vld [vmem:[#allocation8 + $0x38] sm:$0xff]   ;;  %s593_s24 = scalar_lea.vmem %s398_s23, 256  ;;  %p598_p2 = scmp.lt.s32.totalorder %s398_s23, %s398_s23 }
  0x2c   :  { %vm85_vm0 = vcmp.lt.s32.totalorder %v84_v3, 32  ;;  %494 = vmatprep.mubr.msk.bf16.mxu1 %vm627_vm1, %v626_v15  ;;  %479 = vmatpush3.bf16.msra.mxu1 %v517_v23  ;;  %v410_v32 = vld [vmem:[%s718_s1] ss:$0 sm:$0xff]  ;;  %v518_v42 = vld [vmem:[#allocation8 + $0x30] sm:$0xff]   ;;  %v520_v44 = vld [vmem:[#allocation8 + $0x20] sm:$0xff]   ;;  %p594_p1 = scmp.ne.s32.totalorder %s398_s23, %s593_s24  ;;  %p599_p3 = scmp.lt.s32.totalorder %s593_s24, %s593_s24 }
  0x2d   :  { %77 = vadd.xlane.f32.xlu0 %v74_v1  ;;  %480 = vmatprep.subr.bf16.mxu1 %v626_v15  ;;  %v411_v36 = vld [vmem:[%s719_s2] ss:$0 sm:$0xff]  ;;  %v521_v45 = vld [vmem:[#allocation8 + $0x18] sm:$0xff]   ;;  %v522_v46 = vld [vmem:[#allocation8 + $0x10] sm:$0xff]  }
  0x2e   :  { %461 = vmatpush3.bf16.msra.mxu0 %v509_v16  ;;  %v519_v43 = vld [vmem:[#allocation8 + $0x28] sm:$0xff]   ;;  %v524_v48 = vld [vmem:[#allocation8] sm:$0xff]   ;;  %p600_p4 = por %p599_p3, %p598_p2 }
  0x2f   :  { %462 = vmatprep.subr.bf16.mxu0 %v626_v15  ;;  %v523_v47 = vld [vmem:[#allocation8 + $0x8] sm:$0xff]  }
  0x30   :  { %481 = vmatpush3.bf16.msra.mxu1 %v518_v42  ;;  %v414_v49 = vld [vmem:[%s721_s4] ss:$0 sm:$0xff]  ;;  %p601_p5 = pnand %p600_p4, %p594_p1 }
  0x31   :  { %482 = vmatprep.subr.bf16.mxu1 %v626_v15  ;;  %v432_v3 = vld [vmem:[%s723_s6] ss:$0 sm:$0xff] }
  0x32   :  { %463 = vmatpush3.bf16.msra.mxu0 %v510_v17 }
  0x33   :  { %464 = vmatprep.subr.bf16.mxu0 %v626_v15 }
  0x34   :  { %483 = vmatpush3.bf16.msra.mxu1 %v519_v43 }
  0x35   :  { %484 = vmatprep.subr.bf16.mxu1 %v626_v15 }
  0x36   :  { %465 = vmatpush3.bf16.msra.mxu0 %v511_v18 }
  0x37   :  { %466 = vmatprep.subr.bf16.mxu0 %v626_v15 }
  0x38   :  { %485 = vmatpush3.bf16.msra.mxu1 %v520_v44 }
  0x39   :  { %486 = vmatprep.subr.bf16.mxu1 %v626_v15 }
  0x3a   :  { %467 = vmatpush3.bf16.msra.mxu0 %v512_v19 }
  0x3b   :  { %468 = vmatprep.subr.bf16.mxu0 %v626_v15 }
  0x3c   :  { %487 = vmatpush3.bf16.msra.mxu1 %v521_v45 }
  0x3d   :  { %488 = vmatprep.subr.bf16.mxu1 %v626_v15 }
  0x3e   :  { %469 = vmatpush3.bf16.msra.mxu0 %v513_v20 }
  0x3f   :  { %470 = vmatprep.subr.bf16.mxu0 %v626_v15 }
  0x40   :  { %489 = vmatpush3.bf16.msra.mxu1 %v522_v46 }
  0x41   :  { %490 = vmatprep.subr.bf16.mxu1 %v626_v15 }
  0x42   :  { %471 = vmatpush3.bf16.msra.mxu0 %v514_v21 }
  0x43   :  { %472 = vmatprep.subr.bf16.mxu0 %v626_v15 }
  0x44   :  { %491 = vmatpush3.bf16.msra.mxu1 %v523_v47 }
  0x45   :  { %492 = vmatprep.subr.bf16.mxu1 %v626_v15 }
  0x46   :  { %473 = vmatpush3.bf16.msra.mxu0 %v515_v22 }
  0x48   :  { %493 = vmatpush3.bf16.msra.mxu1 %v524_v48 }
  0xb2   :  { %v76_v4 = vpop.xlane.xlu0 %75 }
  0xb3   :  { %v79_v5 = vmul.f32 0.03125, %v76_v4 }
  0xb5   :  { %v81_v6 = vsub.f32 %v73_v0, %v79_v5 }
  0xb6   :  { %v78_v7 = vpop.xlane.xlu0 %77 }
  0xb7   :  { %v80_v8 = vmul.f32 0.03125, %v78_v7  ;;  %v88_v9 = vsel %vm85_vm0, %v81_v6, 0.0 }
  0xb8   :  { %v90_v10 = vmul.f32 %v88_v9, %v88_v9 }
  0xb9   :  { %v82_v11 = vsub.f32 %v74_v1, %v80_v8 }
  0xba   :  { %92 = vadd.xlane.f32.xlu1 %v90_v10 }
  0xbb   :  { %v89_v12 = vsel %vm85_vm0, %v82_v11, 0.0 }
  0xbc   :  { %v91_v13 = vmul.f32 %v89_v12, %v89_v12 }
  0xbe   :  { %94 = vadd.xlane.f32.xlu1 %v91_v13 }
 0x143   :  { %v93_v24 = vpop.xlane.xlu1 %92 }
 0x144   :  { %v96_v25 = vmul.f32 0.03125, %v93_v24 }
 0x146   :  { %v98_v26 = vadd.f32 1e-05, %v96_v25 }
 0x147   :  { %v95_v27 = vpop.xlane.xlu1 %94 }
 0x148   :  { %525 = vrsqrt.f32 %v98_v26  ;;  %v97_v28 = vmul.f32 0.03125, %v95_v27 }
 0x14a   :  { %v99_v29 = vadd.f32 1e-05, %v97_v28 }
 0x14c   :  { %527 = vrsqrt.f32 %v99_v29 }
 0x155   :  { %v526_v30 = vpop.eup %525 }
 0x156   :  { %v102_v31 = vmul.f32 %v526_v30, %v88_v9 }
 0x158   :  { %v111_v34 = vmul.f32 %v410_v32, %v102_v31 }
 0x159   :  { %v528_v33 = vpop.eup %527 }
 0x15a   :  { %v103_v35 = vmul.f32 %v528_v33, %v89_v12  ;;  %v120_v38 = vadd.f32 %v411_v36, %v111_v34 }
 0x15c   :  { %v112_v37 = vmul.f32 %v410_v32, %v103_v35 }
 0x15e   :  { %v121_v39 = vadd.f32 %v411_v36, %v112_v37 }
 0x160   :  { %v438_v40 = vpack.c.bf16 %v121_v39, %v120_v38 }
 0x162   :  { %439 = vst [vmem:[#allocation2] sm:$0xff] %v438_v40  }
 0x169   :  { %v516_v41 = vld [vmem:[#allocation2] sm:$0xff]  }
 0x16a   :  { %475 = vmatmul.mubr.bf16.vlgmr.msra.gmra.mxu0 %v516_v41 }
 0x22a   :  { %v245_v50 = vpop.f32.mrf.mxu0 }
 0x22b   :  { %v246_v51 = vadd.f32 %v414_v49, %v245_v50 }
 0x22c   :  { %v476_v52 = vpop.f32.mrf.mxu0 }
 0x22d   :  { %v254_v53 = vmul.f32 0.70710677, %v246_v51  ;;  %v252_v61 = vmul.f32 0.5, %v246_v51 }
 0x22e   :  { %v248_v54 = vpop.f32.mrf.mxu0 }
 0x22f   :  { %529 = verf.f32 %v254_v53  ;;  %v249_v55 = vadd.f32 %v414_v49, %v248_v54 }
 0x230   :  { %v477_v56 = vpop.f32.mrf.mxu0 }
 0x231   :  { %v255_v57 = vmul.f32 0.70710677, %v249_v55  ;;  %v253_v62 = vmul.f32 0.5, %v249_v55 }
 0x233   :  { %531 = verf.f32 %v255_v57 }
 0x23c   :  { %v530_v58 = vpop.eup %529 }
 0x23d   :  { %v258_v59 = vadd.f32 1.0, %v530_v58 }
 0x23f   :  { %v260_v0 = vmul.f32 %v258_v59, %v252_v61 }
 0x240   :  { %v532_v60 = vpop.eup %531 }
 0x241   :  { %v259_v63 = vadd.f32 1.0, %v532_v60 }
 0x243   :  { %v261_v1 = vmul.f32 %v259_v63, %v253_v62 }
 0x245   :  { %v262_v2 = vpack.c.bf16 %v261_v1, %v260_v0 }
 0x247   :  { %495 = vmatmul.mubr.bf16.vlgmr.msra.gmra.mxu1 %v262_v2 }
 0x307   :  { %v361_v4 = vpop.f32.mrf.mxu1 }
 0x308   :  { %v378_v5 = vadd.f32 %v432_v3, %v361_v4 }
 0x309   :  { %v496_v6 = vpop.f32.mrf.mxu1 }
 0x30a   :  { %380 = vst [vmem:[#allocation9] sm:$0xff] %v378_v5 }
 0x30b   :  { %v364_v7 = vpop.f32.mrf.mxu1 }
 0x30c   :  { %v379_v8 = vadd.f32 %v432_v3, %v364_v7 }
 0x30d   :  { %v497_v9 = vpop.f32.mrf.mxu1 }
 0x30e   :  { %381 = vst [vmem:[#allocation9 + $0x8] sm:$0xff] %v379_v8 }
 0x30f   :  { %604 = shalt.err (!%p601_p5)
}
 0x310   :  { %403 = dma.vmem_to_hbm [thread:$0]  %s398_s23, 256, %s724_s7, [#allocation5], %s623_s11, %s623_s11, %s624_s12  }
 0x311   :  { %617 = dma.done.wait [#allocation5], 256  }
 0x312   :  { %618 = vsyncadd [#allocation5], 4294967040 }
 0x313   :  { %407 = vsyncpa [#allocation4], 1 }
 0x314   :  { %408 = vsyncpa [#allocation7], 1 }
 0x315   :  { %409 = vsyncpa [#allocation5], 1 }

</bundles_post_ra>
